<compile_context>
chip_gen: v7x
topology: tpu7x:2x2x1
jax: 0.10.0
libtpu: 0.0.40
codegen_flags: <defaults>
</compile_context>

<pallas_src>
import jax
import jax.numpy as jnp
from jax.experimental import pallas as pl
from jax.experimental.pallas import tpu as pltpu

SHAPE_DIM = 40
EXP_DIM = 10
ALPHA_DIM = SHAPE_DIM + EXP_DIM          # 50


def _round_up(x, m):
    return ((x + m - 1) // m) * m


def _cdiv(a, b):
    return (a + b - 1) // b


def bfm_kernel(R_ref, offset_ref, beta_ref, w_ref, u_ref, out_ref):
    """One lane tile of: pts = R @ (u + w @ alpha) + offset.

    R_ref      : (3, 3)    f32, SMEM
    offset_ref : (3, 1)    f32, SMEM
    beta_ref   : (3, 3A)   f32, VMEM (resident; beta = R folded with alpha)
    w_ref      : (3A, TN)  bf16/f32, VMEM tile (flattened deviation basis)
    u_ref      : (3, TN)   f32, VMEM tile (mean shape)
    out_ref    : (3, TN)   f32
    """
    # Deviation contribution R @ (w @ alpha): one small MXU dot, f32 accumulate.
    # (bf16->f32 upcast is VPU work hidden under the basis DMA.)
    w = w_ref[...].astype(jnp.float32)                                   # (3A, TN)
    v = jnp.dot(beta_ref[...], w, preferred_element_type=jnp.float32)   # (3, TN)

    # Mean-shape rotation R @ u + offset: scalar-broadcast FMAs, R/offset
    # read from SMEM.  Output: three direct lane-dense row stores (no concat).
    u0 = u_ref[0:1, :]
    u1 = u_ref[1:2, :]
    u2 = u_ref[2:3, :]
    out_ref[0:1, :] = (v[0:1, :] + R_ref[0, 0] * u0 + R_ref[0, 1] * u1
                       + R_ref[0, 2] * u2 + offset_ref[0, 0])
    out_ref[1:2, :] = (v[1:2, :] + R_ref[1, 0] * u0 + R_ref[1, 1] * u1
                       + R_ref[1, 2] * u2 + offset_ref[1, 0])
    out_ref[2:3, :] = (v[2:3, :] + R_ref[2, 0] * u0 + R_ref[2, 1] * u1
                       + R_ref[2, 2] * u2 + offset_ref[2, 0])


def prepare_bfm_basis(u, w, *, tile_n=8192, basis_dtype=jnp.bfloat16):
    """One-time model-init relayout (NOT per forward call).

    u: (3, N) f32 mean shape, w: (3, N, A) f32 deviation basis
    (exact layouts produced by BFMModel_ONNX.__init__).

    Returns (w2d, u_pad, n_verts, tile):
      w2d   : (3*A, N_pad) in `basis_dtype`, row (c*A + a) <- w[c, :, a]
      u_pad : (3, N_pad) f32   (kept f32: mean-shape magnitudes >> basis)
      tile  : lane tile actually used (multiple of 128, divides N_pad)
    """
    _, N, A = w.shape
    # Flatten to 2D: one contiguous DMA per grid step, minimal sublane padding.
    w2d = jnp.transpose(w, (0, 2, 1)).reshape(3 * A, N)                  # (3A, N)

    # Pad N to ~128 granularity, then derive a tile that divides the padded N
    # (bounds wasted streamed columns to <128 per block instead of up to
    #  tile_n-128 when padding straight to a multiple of tile_n).
    n_pad128 = _round_up(N, 128)
    n_blocks = max(1, _cdiv(n_pad128, tile_n))
    tile = _round_up(_cdiv(n_pad128, n_blocks), 128)
    n_pad = tile * n_blocks

    pad = n_pad - N
    if pad:
        w2d = jnp.pad(w2d, ((0, 0), (0, pad)))
        u = jnp.pad(u, ((0, 0), (0, pad)))
    return w2d.astype(basis_dtype), u.astype(jnp.float32), N, tile


def bfm_forward(R, offset, alpha_shp, alpha_exp, w2d, u_pad, n_verts, tile_n):
    """pts3d = R @ (u + w @ alpha) + offset  ->  (3, n_verts) f32."""
    three_a, n_pad = w2d.shape
    A = three_a // 3

    # Fold R into the per-call coefficients: beta[c, c'*A + a] = R[c,c']*alpha[a].
    alpha = jnp.concatenate([alpha_shp, alpha_exp], axis=0).reshape(-1)   # (A,)
    alpha = alpha.astype(jnp.float32)
    beta = (R.astype(jnp.float32)[:, :, None] * alpha[None, None, :]
            ).reshape(3, 3 * A)                                           # (3, 3A)

    out = pl.pallas_call(
        bfm_kernel,
        out_shape=jax.ShapeDtypeStruct((3, n_pad), jnp.float32),
        grid_spec=pltpu.PrefetchScalarGridSpec(
            num_scalar_prefetch=0,
            grid=(n_pad // tile_n,),
            in_specs=[
                pl.BlockSpec(memory_space=pltpu.MemorySpace.SMEM),        # R (3,3)
                pl.BlockSpec(memory_space=pltpu.MemorySpace.SMEM),        # offset (3,1)
                pl.BlockSpec((3, three_a), lambda i: (0, 0)),             # beta (resident)
                pl.BlockSpec((three_a, tile_n), lambda i: (0, i)),        # basis tile (bf16)
                pl.BlockSpec((3, tile_n), lambda i: (0, i)),              # mean-shape tile (f32)
            ],
            out_specs=pl.BlockSpec((3, tile_n), lambda i: (0, i)),
        ),
        # Default scoped VMEM is ample at tile_n<=8192 bf16; raise
        # vmem_limit_bytes here only if pushing tiles much larger (esp. v5e).
        compiler_params=pltpu.CompilerParams(
            dimension_semantics=("parallel",)),
    )(R, offset, beta, w2d, u_pad)
    return out[:, :n_verts]


if __name__ == "__main__":
    key = jax.random.PRNGKey(0)
    kU, kS, kE, kR, kO, kAS, kAE = jax.random.split(key, 7)

    # Small, deliberately non-128-multiple vertex count to exercise padding.
    N = 500

    # Deterministic synthetic "BFM" parameters (shapes as in the module __init__).
    u_flat = jax.random.normal(kU, (N * 3,), dtype=jnp.float32)            # bfm['u']
    w_shp = jax.random.normal(kS, (N * 3, SHAPE_DIM), dtype=jnp.float32)   # bfm['w_shp'][..., :40]
    w_exp = jax.random.normal(kE, (N * 3, EXP_DIM), dtype=jnp.float32)     # bfm['w_exp'][..., :10]

    # Same view/permute logic as BFMModel_ONNX.__init__.
    u = u_flat.reshape(-1, 3).T                                            # (3, N)
    w_cat = jnp.concatenate([w_shp, w_exp], axis=1)                        # (3N, A)
    w = jnp.transpose(w_cat.reshape(-1, 3, ALPHA_DIM), (1, 0, 2))          # (3, N, A)

    # Forward inputs.
    R = jax.random.normal(kR, (3, 3), dtype=jnp.float32)
    offset = jax.random.normal(kO, (3, 1), dtype=jnp.float32)
    alpha_shp = jax.random.normal(kAS, (SHAPE_DIM, 1), dtype=jnp.float32)
    alpha_exp = jax.random.normal(kAE, (EXP_DIM, 1), dtype=jnp.float32)

    # Pure-JAX reference with identical semantics to the PyTorch forward.
    alpha = jnp.concatenate([alpha_shp, alpha_exp], axis=0)                # (A, 1)
    ref = R @ (u + jnp.matmul(w, alpha).squeeze(-1)) + offset              # (3, N)

    # --- Production config: bf16 deviation basis (u stays f32), 2-step grid. ---
    w2d_bf16, u_pad, n_verts, tile = prepare_bfm_basis(
        u, w, tile_n=256, basis_dtype=jnp.bfloat16)
    pts_bf16 = bfm_forward(R, offset, alpha_shp, alpha_exp,
                           w2d_bf16, u_pad, n_verts, tile)
    pts_bf16 = jax.block_until_ready(pts_bf16)
    assert pts_bf16.shape == (3, N)
    assert jnp.allclose(pts_bf16, ref, rtol=5e-2, atol=5e-1), \
        "bf16-basis kernel mismatch vs reference"

    # --- f32 basis: tighter structural check of the same kernel. ---
    w2d_f32, u_pad32, n_verts32, tile32 = prepare_bfm_basis(
        u, w, tile_n=512, basis_dtype=jnp.float32)
    pts_f32 = bfm_forward(R, offset, alpha_shp, alpha_exp,
                          w2d_f32, u_pad32, n_verts32, tile32)
    pts_f32 = jax.block_until_ready(pts_f32)
    assert pts_f32.shape == (3, N)
    assert jnp.allclose(pts_f32, ref, rtol=2e-2, atol=2e-1), \
        "f32-basis kernel mismatch vs reference"

    print("KERNEL_OK")
</pallas_src>

<mosaic_0001>
module attributes {stable_mosaic.version = 11 : i64} {
  func.func @bfm_kernel(%arg0: i32, %arg1: memref<3x3xf32, #tpu.memory_space<smem>>, %arg2: memref<3x1xf32, #tpu.memory_space<smem>>, %arg3: memref<3x150xf32, #tpu.memory_space<vmem>>, %arg4: memref<150x256xbf16, #tpu.memory_space<vmem>>, %arg5: memref<3x256xf32, #tpu.memory_space<vmem>>, %arg6: memref<3x256xf32, #tpu.memory_space<vmem>>) attributes {dimension_semantics = [#tpu.dimension_semantics<parallel>], iteration_bounds = array<i64: 2>, scalar_prefetch = 0 : i64, scratch_operands = 0 : i64, tpu.core_type = #tpu.core_type<tc>, window_params = [{transform_indices = @transform_0, window_bounds = array<i64: 3, 3>}, {transform_indices = @transform_1, window_bounds = array<i64: 3, 1>}, {pipeline_mode = #tpu.pipeline_mode<synchronous>, transform_indices = @transform_2, window_bounds = array<i64: 3, 150>}, {transform_indices = @transform_3, window_bounds = array<i64: 150, 256>}, {transform_indices = @transform_4, window_bounds = array<i64: 3, 256>}, {transform_indices = @transform_5, window_bounds = array<i64: 3, 256>}]} {
    %c0 = arith.constant 0 : index
    %c0_0 = arith.constant 0 : index
    %0 = vector.load %arg4[%c0, %c0_0] : memref<150x256xbf16, #tpu.memory_space<vmem>>, vector<150x256xbf16>
    %1 = arith.extf %0 : vector<150x256xbf16> to vector<150x256xf32>
    %c0_1 = arith.constant 0 : index
    %c0_2 = arith.constant 0 : index
    %2 = vector.load %arg3[%c0_1, %c0_2] : memref<3x150xf32, #tpu.memory_space<vmem>>, vector<3x150xf32>
    %cst = arith.constant dense<0.000000e+00> : vector<3x256xf32>
    %3 = tpu.matmul %2, %1, %cst {dimension_numbers = #tpu.dot_dimension_numbers<[1], [0], [0], [1], [0, 0, 1, 1], [], []>} : vector<3x150xf32>, vector<150x256xf32>, vector<3x256xf32> -> vector<3x256xf32>
    %c0_3 = arith.constant 0 : index
    %c0_4 = arith.constant 0 : index
    %4 = vector.load %arg5[%c0_3, %c0_4] : memref<3x256xf32, #tpu.memory_space<vmem>>, vector<1x256xf32>
    %c1 = arith.constant 1 : index
    %c0_5 = arith.constant 0 : index
    %5 = vector.load %arg5[%c1, %c0_5] : memref<3x256xf32, #tpu.memory_space<vmem>>, vector<1x256xf32>
    %c2 = arith.constant 2 : index
    %c0_6 = arith.constant 0 : index
    %6 = vector.load %arg5[%c2, %c0_6] : memref<3x256xf32, #tpu.memory_space<vmem>>, vector<1x256xf32>
    %7 = vector.extract_strided_slice %3 {offsets = [0, 0], sizes = [1, 256], strides = [1, 1]} : vector<3x256xf32> to vector<1x256xf32>
    %c0_7 = arith.constant 0 : index
    %c0_8 = arith.constant 0 : index
    %8 = memref.load %arg1[%c0_7, %c0_8] : memref<3x3xf32, #tpu.memory_space<smem>>
    %9 = vector.broadcast %8 : f32 to vector<1x256xf32>
    %10 = arith.mulf %9, %4 : vector<1x256xf32>
    %11 = arith.addf %7, %10 : vector<1x256xf32>
    %c0_9 = arith.constant 0 : index
    %c1_10 = arith.constant 1 : index
    %12 = memref.load %arg1[%c0_9, %c1_10] : memref<3x3xf32, #tpu.memory_space<smem>>
    %13 = vector.broadcast %12 : f32 to vector<1x256xf32>
    %14 = arith.mulf %13, %5 : vector<1x256xf32>
    %15 = arith.addf %11, %14 : vector<1x256xf32>
    %c0_11 = arith.constant 0 : index
    %c2_12 = arith.constant 2 : index
    %16 = memref.load %arg1[%c0_11, %c2_12] : memref<3x3xf32, #tpu.memory_space<smem>>
    %17 = vector.broadcast %16 : f32 to vector<1x256xf32>
    %18 = arith.mulf %17, %6 : vector<1x256xf32>
    %19 = arith.addf %15, %18 : vector<1x256xf32>
    %c0_13 = arith.constant 0 : index
    %c0_14 = arith.constant 0 : index
    %20 = memref.load %arg2[%c0_13, %c0_14] : memref<3x1xf32, #tpu.memory_space<smem>>
    %21 = vector.broadcast %20 : f32 to vector<1x256xf32>
    %22 = arith.addf %19, %21 : vector<1x256xf32>
    %c0_15 = arith.constant 0 : index
    %c0_16 = arith.constant 0 : index
    %23 = vector.load %arg6[%c0_15, %c0_16] : memref<3x256xf32, #tpu.memory_space<vmem>>, vector<1x256xf32>
    tpu.vector_store %arg6[%c0_15, %c0_16], %22 {strides = array<i32>} : memref<3x256xf32, #tpu.memory_space<vmem>>, vector<1x256xf32>,
    %24 = vector.extract_strided_slice %3 {offsets = [1, 0], sizes = [1, 256], strides = [1, 1]} : vector<3x256xf32> to vector<1x256xf32>
    %c1_17 = arith.constant 1 : index
    %c0_18 = arith.constant 0 : index
    %25 = memref.load %arg1[%c1_17, %c0_18] : memref<3x3xf32, #tpu.memory_space<smem>>
    %26 = vector.broadcast %25 : f32 to vector<1x256xf32>
    %27 = arith.mulf %26, %4 : vector<1x256xf32>
    %28 = arith.addf %24, %27 : vector<1x256xf32>
    %c1_19 = arith.constant 1 : index
    %c1_20 = arith.constant 1 : index
    %29 = memref.load %arg1[%c1_19, %c1_20] : memref<3x3xf32, #tpu.memory_space<smem>>
    %30 = vector.broadcast %29 : f32 to vector<1x256xf32>
    %31 = arith.mulf %30, %5 : vector<1x256xf32>
    %32 = arith.addf %28, %31 : vector<1x256xf32>
    %c1_21 = arith.constant 1 : index
    %c2_22 = arith.constant 2 : index
    %33 = memref.load %arg1[%c1_21, %c2_22] : memref<3x3xf32, #tpu.memory_space<smem>>
    %34 = vector.broadcast %33 : f32 to vector<1x256xf32>
    %35 = arith.mulf %34, %6 : vector<1x256xf32>
    %36 = arith.addf %32, %35 : vector<1x256xf32>
    %c1_23 = arith.constant 1 : index
    %c0_24 = arith.constant 0 : index
    %37 = memref.load %arg2[%c1_23, %c0_24] : memref<3x1xf32, #tpu.memory_space<smem>>
    %38 = vector.broadcast %37 : f32 to vector<1x256xf32>
    %39 = arith.addf %36, %38 : vector<1x256xf32>
    %c1_25 = arith.constant 1 : index
    %c0_26 = arith.constant 0 : index
    %40 = vector.load %arg6[%c1_25, %c0_26] : memref<3x256xf32, #tpu.memory_space<vmem>>, vector<1x256xf32>
    tpu.vector_store %arg6[%c1_25, %c0_26], %39 {strides = array<i32>} : memref<3x256xf32, #tpu.memory_space<vmem>>, vector<1x256xf32>,
    %41 = vector.extract_strided_slice %3 {offsets = [2, 0], sizes = [1, 256], strides = [1, 1]} : vector<3x256xf32> to vector<1x256xf32>
    %c2_27 = arith.constant 2 : index
    %c0_28 = arith.constant 0 : index
    %42 = memref.load %arg1[%c2_27, %c0_28] : memref<3x3xf32, #tpu.memory_space<smem>>
    %43 = vector.broadcast %42 : f32 to vector<1x256xf32>
    %44 = arith.mulf %43, %4 : vector<1x256xf32>
    %45 = arith.addf %41, %44 : vector<1x256xf32>
    %c2_29 = arith.constant 2 : index
    %c1_30 = arith.constant 1 : index
    %46 = memref.load %arg1[%c2_29, %c1_30] : memref<3x3xf32, #tpu.memory_space<smem>>
    %47 = vector.broadcast %46 : f32 to vector<1x256xf32>
    %48 = arith.mulf %47, %5 : vector<1x256xf32>
    %49 = arith.addf %45, %48 : vector<1x256xf32>
    %c2_31 = arith.constant 2 : index
    %c2_32 = arith.constant 2 : index
    %50 = memref.load %arg1[%c2_31, %c2_32] : memref<3x3xf32, #tpu.memory_space<smem>>
    %51 = vector.broadcast %50 : f32 to vector<1x256xf32>
    %52 = arith.mulf %51, %6 : vector<1x256xf32>
    %53 = arith.addf %49, %52 : vector<1x256xf32>
    %c2_33 = arith.constant 2 : index
    %c0_34 = arith.constant 0 : index
    %54 = memref.load %arg2[%c2_33, %c0_34] : memref<3x1xf32, #tpu.memory_space<smem>>
    %55 = vector.broadcast %54 : f32 to vector<1x256xf32>
    %56 = arith.addf %53, %55 : vector<1x256xf32>
    %c2_35 = arith.constant 2 : index
    %c0_36 = arith.constant 0 : index
    %57 = vector.load %arg6[%c2_35, %c0_36] : memref<3x256xf32, #tpu.memory_space<vmem>>, vector<1x256xf32>
    tpu.vector_store %arg6[%c2_35, %c0_36], %56 {strides = array<i32>} : memref<3x256xf32, #tpu.memory_space<vmem>>, vector<1x256xf32>,
    return
  }
  func.func @transform_0(%arg0: i32) -> (i32, i32) {
    %c0_i32 = arith.constant 0 : i32
    %c0_i32_0 = arith.constant 0 : i32
    %c0_i32_1 = arith.constant 0 : i32
    return %c0_i32, %c0_i32_0 : i32, i32
  }
  func.func @transform_1(%arg0: i32) -> (i32, i32) {
    %c0_i32 = arith.constant 0 : i32
    %c0_i32_0 = arith.constant 0 : i32
    %c0_i32_1 = arith.constant 0 : i32
    return %c0_i32, %c0_i32_0 : i32, i32
  }
  func.func @transform_2(%arg0: i32) -> (i32, i32) {
    %c0_i32 = arith.constant 0 : i32
    %c0_i32_0 = arith.constant 0 : i32
    %c0_i32_1 = arith.constant 0 : i32
    return %c0_i32, %c0_i32_0 : i32, i32
  }
  func.func @transform_3(%arg0: i32) -> (i32, i32) {
    %c0_i32 = arith.constant 0 : i32
    %c0_i32_0 = arith.constant 0 : i32
    return %c0_i32, %arg0 : i32, i32
  }
  func.func @transform_4(%arg0: i32) -> (i32, i32) {
    %c0_i32 = arith.constant 0 : i32
    %c0_i32_0 = arith.constant 0 : i32
    return %c0_i32, %arg0 : i32, i32
  }
  func.func @transform_5(%arg0: i32) -> (i32, i32) {
    %c0_i32 = arith.constant 0 : i32
    %c0_i32_0 = arith.constant 0 : i32
    return %c0_i32, %arg0 : i32, i32
  }
}

</mosaic_0001>

<bundles_post_ra>
// kernel: tpu_custom_call.1
= control target key start
LH: loop header
LB: loop body
LE: loop exit
PB: predicated region body
PF: predicated region fallthrough
CT: control target
= control target key end

     0   :  { %10 = vsyncpa [#allocation5], 0  ;;  %s1487_s0 = inlined_call_operand.vmem [shape: f32[3,3], index: 0, kind: input, shape index: {}]   ;;  %s1488_s1 = inlined_call_operand.vmem [shape: f32[3,1], index: 1, kind: input, shape index: {}]   ;;  %s1489_s2 = inlined_call_operand.hbm [shape: f32[3,150], index: 2, kind: input, shape index: {}]   ;;  %s1490_s3 = inlined_call_operand.hbm [shape: bf16[150,512], index: 3, kind: input, shape index: {}]   ;;  %s1491_s4 = inlined_call_operand.vmem [shape: f32[3,512], index: 4, kind: input, shape index: {}]   ;;  %s1492_s5 = inlined_call_operand.hbm [shape: f32[3,512], index: 5, kind: output, shape index: {}]  }
   0x1   :  { %11 = vsyncpa [#allocation7], 0 }
   0x2   :  { %12 = vsyncpa [#allocation3], 0 }
   0x3   :  { %13 = vsyncpa [#allocation10], 0 }
   0x4   :  { %15 = vsyncpa [#allocation10 + $0x1], 0 }
   0x5   :  { %16 = vsyncpa [#allocation4], 0 }
   0x6   :  { %18 = vsyncpa [#allocation4 + $0x1], 0  ;;  %s1216_s18 = smov 0   ;;  %s1218_s19 = smov 0  }
   0x7   :  { %s1220_s20 = smov 0   ;;  %s1222_s21 = smov 0  }
   0x8 LB: > { %s1237_s22 = sadd.s32 4294967295, %s1175_s21   ;;  %s805_s23 = sadd.s32 4294967294, %s1175_s21   ;;  %s1175_s21 = sphi %s1222_s21, %s1520_s21   ;;  %s1171_s20 = sphi %s1220_s20, %s1519_s20   ;;  %s1167_s19 = sphi %s1218_s19, %s1518_s19   ;;  %s1163_s18 = sphi %s1216_s18, %s1517_s18  }
   0x9   : > { %s1241_s24 = sadd.s32 1, %s1175_s21   ;;  %s94_s25 = sadd.s32 1, %s1171_s20 }
   0xa   : > { %s91_s26 = ssub.s32 %s1175_s21, %s1241_s24  ;;  %p101_p0 = scmp.ne.s32.totalorder %s1171_s20, %s1167_s19 }
   0xb   : > { %p92_p1 = scmp.eq.s32.totalorder %s91_s26, 0  ;;  %p102_p2 = scmp.eq.s32.totalorder %s1175_s21, 0 }
   0xc   : > { %p107_p3 = scmp.ne.s32.totalorder %s1167_s19, %s1163_s18  ;;  %p1493_p4 = scmp.eq.s32.totalorder %s1237_s22, 0 }
   0xd   : > { %s1253_s27 = scalar_select %p92_p1, %s1171_s20, %s94_s25  }
   0xe   : > { %p1255_p5 = por %p102_p2, %p101_p0  ;;  %p1261_p6 = por %p1493_p4, %p107_p3 }
   0xf   : > { %p157_p7 = scmp.eq.s32.totalorder %s1237_s22, 1  ;;  %p163_p8 = scmp.eq.s32.totalorder %s805_s23, 1 }
  0x10   : > { %s1499_s29 = scalar_select %p1261_p6, 1, 0 }
  0x11   : > { %p806_p9 = scmp.ge.s32.totalorder %s1175_s21, 1  ;;  %p170_p10 = scmp.lt.s32.totalorder %s1175_s21, 3 }
  0x12   : > { %p1268_p11 = por %p157_p7, %p101_p0  ;;  %p1272_p12 = por %p163_p8, %p107_p3 }
  0x13   : > { %p1276_p13 = pnand %p806_p9, %p170_p10  ;;  %s183_s10 = sshll.u32 %s1487_s0, 4  ;;  %s184_s10 = int_to_ptr.vmem [resolvable:$true] %s183_s10 }
  0x14   : > { %s1500_s30 = scalar_select %p1268_p11, 1, 0 }
  0x15   : > { %s1501_s6 = scalar_select %p1272_p12, 1, 0 }
  0x16   : > { %s1502_s7 = scalar_select %p1276_p13, 1, 0 }
  0x17   : > { %p916_p1 = pneg %p1276_p13  ;;  %p937_p2 = scmp.lt.s32.totalorder %s1175_s21, 2 }
  0x18   : > { %s194_s14 = sshll.u32 %s1488_s1, 4  ;;  %s1009_s16 = scalar_lea.vmem %s184_s10, 64  ;;  %s195_s14 = int_to_ptr.vmem [resolvable:$true] %s194_s14 }
  0x19   : > { %p1289_p7 = pnand %p916_p1, %p1493_p4  ;;  %p1298_p3 = pnand %p937_p2, %p1255_p5 }
  0x1a   : > { %p1010_p8 = scmp.ne.s32.totalorder %s184_s10, %s1009_s16  ;;  %p1017_p0 = scmp.lt.s32.totalorder %s184_s10, %s184_s10 }
  0x1b   : > { %s1504_s15 = scalar_select %p1298_p3, 1, 0 }
  0x1c   : > { %p1011_p9 = pneg %p1289_p7  ;;  %p1018_p4 = scmp.lt.s32.totalorder %s1009_s16, %s1009_s16 }
  0x1e   : > { %p1012_p10 = pnand %p1011_p9, %p1010_p8  ;;  %p1019_p12 = por %p1018_p4, %p1017_p0 }
  0x20   : > { %p1013_p1 = pneg %p1012_p10 }
  0x22   : > { %p1020_p11 = pnand %p1019_p12, %p1013_p1 }
  0x24   : > { %1023 = shalt.err (!%p1020_p11)
}
  0x25   : > { %s1177_s17 = smov [#allocation2]   ;;  %s1024_s23 = scalar_lea.vmem %s195_s14, 64 }
  0x26   : > { %919 = dma.vmem_to_smem (!%p1289_p7), %s184_s10, 64, %s1177_s17, [#allocation5]  }
  0x27   : > { %p1025_p5 = scmp.ne.s32.totalorder %s195_s14, %s1024_s23  ;;  %p1032_p13 = scmp.lt.s32.totalorder %s195_s14, %s195_s14 }
  0x28   : > { %p1033_p3 = scmp.lt.s32.totalorder %s1024_s23, %s1024_s23 }
  0x29   : > { %p1027_p2 = pnand %p1025_p5, %p1011_p9 }
  0x2a   : > { %p1034_p8 = por %p1033_p3, %p1032_p13 }
  0x2b   : > { %p1028_p6 = pneg %p1027_p2 }
  0x2d   : > { %p1035_p10 = pnand %p1034_p8, %p1028_p6 }
  0x2f   : > { %1038 = shalt.err (!%p1035_p10)
}
  0x30   : > { %s1178_s25 = smov [#allocation6]   ;;  %s1179_s26 = smov [#allocation8]  }
  0x31   : > { %922 = dma.vmem_to_smem (!%p1289_p7), %s195_s14, 64, %s1178_s25, [#allocation7]  }
  0x32   : > { %s205_s28 = sshll.u32 %s1179_s26, 4  ;;  %s216_s8 = sand.u32 1, %s1171_s20   ;;  %s206_s28 = int_to_ptr.vmem [resolvable:$true] %s205_s28 }
  0x33   : > { %s1039_s12 = scalar_lea.hbm %s1489_s2, 128 }
  0x34   : > { %p1040_p4 = scmp.ne.s32.totalorder %s1489_s2, %s1039_s12  ;;  %p1046_p12 = scmp.lt.u32.totalorder %s1039_s12, %s1489_s2 }
  0x36   : > { %p1042_p6 = pnand %p1040_p4, %p1011_p9 }
  0x38   : > { %p1043_p11 = pneg %p1042_p6 }
  0x3a   : > { %p1048_p13 = pnand %p1046_p12, %p1043_p11 }
  0x3c   : > { %1051 = shalt.err (!%p1048_p13)
}
  0x3d   : > { %s1052_s14 = scalar_lea.vmem %s206_s28, 128  ;;  %p1060_p5 = scmp.lt.s32.totalorder %s206_s28, %s206_s28 }
  0x3e   : > { %p1053_p0 = scmp.ne.s32.totalorder %s206_s28, %s1052_s14  ;;  %p1061_p2 = scmp.lt.s32.totalorder %s1052_s14, %s1052_s14 }
  0x40   : > { %p1055_p3 = pnand %p1053_p0, %p1011_p9  ;;  %p1062_p8 = por %p1061_p2, %p1060_p5 }
  0x42   : > { %p1056_p1 = pneg %p1055_p3 }
  0x44   : > { %p1063_p10 = pnand %p1062_p8, %p1056_p1 }
  0x46   : > { %1066 = shalt.err (!%p1063_p10)
}
  0x47   : > { %925 = dma.hbm_to_vmem [thread:$0]  (!%p1289_p7), %s1489_s2, 128, %s206_s28, [#allocation3]  }
  0x48   : > { %s898_s9 = smul.u32 152, %s216_s8  ;;  %s842_s10 = sshll.u32 %s1175_s21, 7 }
  0x49   : > { %s1339_s16 = scalar_lea.hbm %s1490_s3, %s842_s10  ;;  %s1343_s23 = scalar_lea.sflag [#allocation10], %s216_s8 }
  0x4a   : > { %s220_s17 = scalar_lea.vmem [#allocation9], %s898_s9  ;;  %s1067_s14 = scalar_lea.hbm %s1339_s16, 2432 }
  0x4b   : > { %s227_s11 = sshll.u32 %s220_s17, 4  ;;  %p1068_p9 = scmp.ne.s32.totalorder %s1339_s16, %s1067_s14  ;;  %s1341_s11 = int_to_ptr.vmem [resolvable:$true] %s227_s11 }
  0x4c   : > { %p1505_p7 = scmp.ne.s32.totalorder %s1504_s15, 0  ;;  %s1072_s26 = scalar_lea.hbm %s1490_s3, 4864 }
  0x4d   : > { %p1073_p12 = scmp.lt.u32.totalorder %s1339_s16, %s1490_s3  ;;  %p1074_p13 = scmp.lt.u32.totalorder %s1072_s26, %s1067_s14 }
  0x4e   : > { %p1069_p4 = pneg %p1505_p7  ;;  %p1076_p3 = scmp.lt.u32.totalorder %s1067_s14, %s1339_s16 }
  0x4f   : > { %p1075_p0 = por %p1074_p13, %p1073_p12 }
  0x50   : > { %p1070_p6 = pnand %p1069_p4, %p1068_p9 }
  0x51   : > { %p1077_p1 = por %p1076_p3, %p1075_p0 }
  0x52   : > { %p1071_p11 = pneg %p1070_p6 }
  0x54   : > { %p1078_p5 = pnand %p1077_p1, %p1071_p11 }
  0x56   : > { %1081 = shalt.err (!%p1078_p5)
}
  0x57   : > { %s1082_s8 = scalar_lea.vmem %s1341_s11, 2432  ;;  %s1180_s9 = smov [#allocation9]  }
  0x58   : > { %p1083_p2 = scmp.ne.s32.totalorder %s1341_s11, %s1082_s8  ;;  %s1087_s13 = sshll.u32 %s1180_s9, 4  ;;  %s1088_s13 = int_to_ptr.vmem [resolvable:$false] %s1087_s13 }
  0x59   : > { %s1089_s17 = scalar_lea.vmem %s1088_s13, 4864  ;;  %p1090_p9 = scmp.lt.s32.totalorder %s1341_s11, %s1088_s13 }
  0x5a   : > { %p1085_p8 = pnand %p1083_p2, %p1069_p4  ;;  %p1091_p6 = scmp.lt.s32.totalorder %s1089_s17, %s1082_s8 }
  0x5c   : > { %p1086_p10 = pneg %p1085_p8  ;;  %p1092_p12 = por %p1091_p6, %p1090_p9 }
  0x5e   : > { %p1093_p13 = pnand %p1092_p12, %p1086_p10 }
  0x60   : > { %1096 = shalt.err (!%p1093_p13)
}
  0x61   : > { %s1181_s14 = smov 256   ;;  %s1182_s28 = smov 128  }
  0x62   : > { %s1183_s25 = smov 8   ;;  %p1506_p4 = scmp.ne.s32.totalorder %s1502_s7, 0 }
  0x63   : > { %929 = dma.hbm_to_vmem [thread:$0]  (!%p1505_p7), %s1339_s16, 2432, %s1341_s11, %s1343_s23, %s1181_s14, %s1182_s28, %s1183_s25  }
  0x64   : > { %248 = sbr.rel (%p1506_p4) target bundleno = 404 (0x194), region = 40  ;;  %p1507_p11 = scmp.eq.s32.totalorder (!%p1506_p4), %s1237_s22, 0 }
  0x6b   : > { %1142 = dma.done.wait (%p1507_p11), [#allocation5], 64   ;;  %p1508_p0 = pmov %p1507_p11 }
  0x6d   : > { %1144 = vsyncadd (%p1508_p0), [#allocation5], 4294967232  ;;  %p1509_p3 = pmov %p1508_p0 }
  0x6e   : > { %p1510_p1 = pmov %p1508_p0 }
  0x6f   : > { %1146 = dma.done.wait (%p1509_p3), [#allocation7], 64  }
  0x70   : > { %1148 = vsyncadd (%p1510_p1), [#allocation7], 4294967232  ;;  %p1511_p5 = pmov %p1508_p0 }
  0x71   : > { %p1512_p7 = pmov %p1508_p0 }
  0x72   : > { %1150 = dma.done.wait (%p1511_p5), [#allocation3], 128  }
  0x73   : > { %1152 = vsyncadd (%p1512_p7), [#allocation3], 4294967168  ;;  %s1386_s7 = sand.u32 1, %s1167_s19   ;;  %p1513_p2 = scmp.ne.s32.totalorder %s1499_s29, 0 }
  0x74   : > { %s899_s15 = smul.u32 152, %s1386_s7  ;;  %s263_s16 = scalar_lea.sflag [#allocation10], %s1386_s7 }
  0x76   : > { %s1390_s11 = scalar_lea.vmem [#allocation9], %s899_s15 }
  0x77   : > { %1154 = dma.done.wait (%p1513_p2), %s263_s16, 2432  }
  0x78   : > { %1156 = vsyncadd (%p1513_p2), %s263_s16, 4294964864 }
  0x79   : > { %271 = sfence }
  0x7a   : > { %v981_v0 = vld [vmem:[%s1390_s11 + $0x4] ss:$8 sps:$4 sm:$0xff]   ;;  %v983_v1 = vld [vmem:[%s1390_s11] ss:$8 sps:$4 sm:$0xff]   ;;  %v984_v2 = vld [vmem:[%s1390_s11 + $0x14] ss:$8 sps:$4 sm:$0xff]   ;;  %v457_v23 = vlaneseq }
  0x7b   : > { %845 = vmatprep.subr.bf16.mxu0 %v981_v0  ;;  %v986_v3 = vld [vmem:[%s1390_s11 + $0x10] ss:$8 sps:$4 sm:$0xff]   ;;  %v987_v4 = vld [vmem:[%s1390_s11 + $0x24] ss:$8 sps:$4 sm:$0xff]   ;;  %v989_v5 = vld [vmem:[%s1390_s11 + $0x20] ss:$8 sps:$4 sm:$0xff]  }
  0x7c   : > { %847 = vmatpush1.bf16.msra.mxu0 %v983_v1  ;;  %v990_v6 = vld [vmem:[%s1390_s11 + $0x34] ss:$8 sps:$4 sm:$0xff]   ;;  %v992_v7 = vld [vmem:[%s1390_s11 + $0x30] ss:$8 sps:$4 sm:$0xff]   ;;  %v993_v8 = vld [vmem:[%s1390_s11 + $0x44] ss:$8 sps:$4 sm:$0xff]  }
  0x7d   : > { %849 = vmatprep.subr.bf16.mxu0 %v984_v2  ;;  %v364_v9 = vld [vmem:[#allocation8] sm:$0x77]  ;;  %vm367_vm0 = vcmask 179200   ;;  %v325_v19 = vld [vmem:[%s1390_s11 + $0x90] sm:$0x77]  ;;  %vm370_vm1 = vcmask 1045504  }
  0x7e   : > { %v366_v10 = vcombine.high %v364_v9, %v364_v9  ;;  %v995_v11 = vld [vmem:[%s1390_s11 + $0x40] ss:$8 sps:$4 sm:$0xff]   ;;  %v996_v12 = vld [vmem:[%s1390_s11 + $0x54] ss:$8 sps:$4 sm:$0xff]   ;;  %v998_v13 = vld [vmem:[%s1390_s11 + $0x50] ss:$8 sps:$4 sm:$0xff]   ;;  %v363_v21 = vunpack.c.h.bf16 %v325_v19  ;;  %v362_v22 = vunpack.c.l.bf16 %v325_v19 }
  0x7f   : > { %v999_v14 = vld [vmem:[%s1390_s11 + $0x64] ss:$8 sps:$4 sm:$0xff]   ;;  %v1001_v15 = vld [vmem:[%s1390_s11 + $0x60] ss:$8 sps:$4 sm:$0xff]   ;;  %v1002_v16 = vld [vmem:[%s1390_s11 + $0x74] ss:$8 sps:$4 sm:$0xff]  }
  0x80   : > { %851 = vmatpush1.bf16.msra.mxu0 %v986_v3  ;;  %822 = vmatprep.mubr.msk.f32.mxu0 %vm367_vm0, %v366_v10  ;;  %v1004_v17 = vld [vmem:[%s1390_s11 + $0x70] ss:$8 sps:$4 sm:$0xff]   ;;  %v1005_v18 = vld [vmem:[%s1390_s11 + $0x84] ss:$8 sps:$4 sm:$0xff]   ;;  %v1007_v20 = vld [vmem:[%s1390_s11 + $0x80] ss:$8 sps:$4 sm:$0xff]  }
  0x81   : > { %853 = vmatprep.subr.bf16.mxu0 %v987_v4  ;;  %s818_s29 = sshll.u32 %s1237_s22, 1  ;;  %s453_s23 = sld [smem:[#allocation2]]  ;;  %v1422_v24 = vshrl.u32 %v457_v23, 7  ;;  %v1184_v2 = vmov 1966171168   ;;  %vm525_vm2 = vcmp.lt.s32.totalorder %v457_v23, 256 }
  0x82   : > { %p301_p8 = scmp.lt.s32.totalorder %s818_s29, 3  ;;  %s827_s26 = sld [smem:[#allocation2 + $0x80]]  ;;  %v509_v3 = vunpack.c.l.s4 %v1184_v2 }
  0x83   : > { %s825_s10 = sld [smem:[#allocation2 + $0x1]]  ;;  %s832_s12 = sld [smem:[#allocation2 + $0x100]]  ;;  %v459_v34 = vsub.s32 0, %v1422_v24  ;;  %v463_v43 = vsub.s32 1, %v1422_v24 }
  0x84   : > { %855 = vmatpush1.bf16.msra.mxu0 %v989_v5  ;;  %s1522_s29 = smov (!%p301_p8, %s818_s29), 3  ;;  %s828_s9 = sld [smem:[#allocation2 + $0x81]]  ;;  %v510_v19 = vunpack.c.0.s8 %v509_v3 }
  0x85   : > { %857 = vmatprep.subr.bf16.mxu0 %v990_v6  ;;  %s819_s8 = sshll.u32 %s1522_s29, 2  ;;  %s826_s13 = sld [smem:[#allocation2 + $0x2]] }
  0x86   : > { %s829_s17 = sld [smem:[#allocation2 + $0x82]]  ;;  %s833_s14 = sld [smem:[#allocation2 + $0x101]] }
  0x87   : > { %s304_s15 = scalar_lea.vmem %s1491_s4, %s819_s8  ;;  %s1419_s16 = sld [smem:[#allocation2 + $0x102]]  ;;  %v454_v26 = vstv %s453_s23 }
  0x88   : > { %859 = vmatpush1.bf16.msra.mxu0 %v992_v7  ;;  %v448_v25 = vld [vmem:[%s304_s15] ss:$4 sm:$0x3]  ;;  %v823_v27 = vld [vmem:[%s304_s15 + $0x1] ss:$4 sm:$0x3]  ;;  %v529_v29 = vstv %s827_s26 }
  0x89   : > { %861 = vmatprep.subr.bf16.mxu0 %v993_v8  ;;  %v470_v28 = vstv %s825_s10  ;;  %v602_v30 = vstv %s832_s12  ;;  %v824_v32 = vld [vmem:[%s304_s15 + $0x2] ss:$4 sm:$0x3]  ;;  %v455_v33 = vmul.f32 %v454_v26, %v448_v25  ;;  %v530_v38 = vmul.f32 %v529_v29, %v448_v25  ;;  %s1425_s11 = sld [smem:[#allocation6]]  ;;  %s817_s26 = sshll.u32 %s1386_s7, 3 }
  0x8a   : > { %v545_v31 = vstv %s828_s9  ;;  %v471_v37 = vmul.f32 %v823_v27, %v470_v28  ;;  %v603_v39 = vmul.f32 %v602_v30, %v448_v25  ;;  %s1429_s29 = sld [smem:[#allocation6 + $0x80]]  ;;  %s843_s10 = sshll.u32 %s1237_s22, 7 }
  0x8b   : > { %v486_v35 = vstv %s826_s13  ;;  %v546_v41 = vmul.f32 %v823_v27, %v545_v31  ;;  %v460_v46 = vrot.slane %v455_v33, %v459_v34  ;;  %s1431_s23 = sld [smem:[#allocation6 + $0x100]]  ;;  %v535_v49 = vrot.slane %v530_v38, %v459_v34  ;;  %s298_s12 = scalar_lea.vmem [#allocation11], %s817_s26 }
  0x8c   : > { %863 = vmatpush1.bf16.msra.mxu0 %v995_v11  ;;  %v561_v36 = vstv %s829_s17  ;;  %v618_v40 = vstv %s833_s14  ;;  %v487_v44 = vmul.f32 %v824_v32, %v486_v35  ;;  %v476_v48 = vrot.slane %v471_v37, %v459_v34  ;;  %s689_s8 = sshll.u32 %s298_s12, 4  ;;  %s1443_s17 = scalar_lea.hbm %s1492_s5, %s843_s10  ;;  %s1445_s8 = int_to_ptr.vmem [resolvable:$true] %s689_s8 }
  0x8d   : > { %865 = vmatprep.subr.bf16.mxu0 %v996_v12  ;;  %v634_v42 = vstv %s1419_s16  ;;  %v562_v45 = vmul.f32 %v824_v32, %v561_v36  ;;  %v619_v47 = vmul.f32 %v823_v27, %v618_v40  ;;  %v608_v50 = vrot.slane %v603_v39, %v459_v34  ;;  %s675_s22 = scalar_lea.sflag [#allocation4], %s1386_s7  ;;  %s1097_s14 = scalar_lea.vmem %s1445_s8, 128 }
  0x8e   : > { %v635_v51 = vmul.f32 %v824_v32, %v634_v42  ;;  %v551_v52 = vrot.slane %v546_v41, %v459_v34  ;;  %v464_v53 = vrot.slane %v455_v33, %v463_v43  ;;  %v480_v54 = vrot.slane %v471_v37, %v463_v43  ;;  %p1098_p10 = scmp.ne.s32.totalorder %s1445_s8, %s1097_s14  ;;  %p1514_p9 = scmp.ne.s32.totalorder %s1500_s30, 0 }
  0x8f   : > { %v492_v55 = vrot.slane %v487_v44, %v459_v34  ;;  %v567_v56 = vrot.slane %v562_v45, %v459_v34  ;;  %v539_v57 = vrot.slane %v530_v38, %v463_v43  ;;  %v612_v58 = vrot.slane %v603_v39, %v463_v43  ;;  %s1185_s28 = smov [#allocation11]  }
  0x90   : > { %867 = vmatpush1.bf16.msra.mxu0 %v998_v13  ;;  %v624_v59 = vrot.slane %v619_v47, %v459_v34  ;;  %v496_v60 = vrot.slane %v487_v44, %v463_v43  ;;  %v555_v61 = vrot.slane %v546_v41, %v463_v43  ;;  %v571_v62 = vrot.slane %v562_v45, %v463_v43  ;;  %p1099_p6 = pnand %p1098_p10, %p1514_p9  ;;  %s1101_s25 = sshll.u32 %s1185_s28, 4  ;;  %s1102_s25 = int_to_ptr.vmem [resolvable:$false] %s1101_s25 }
  0x91   : > { %869 = vmatprep.subr.bf16.mxu0 %v999_v14  ;;  %v640_v0 = vrot.slane %v635_v51, %v459_v34  ;;  %v502_v1 = vstv %s1425_s11  ;;  %v628_v4 = vrot.slane %v619_v47, %v463_v43  ;;  %v577_v12 = vstv %s1429_s29  ;;  %s1103_s15 = scalar_lea.vmem %s1102_s25, 256  ;;  %p1104_p13 = scmp.lt.s32.totalorder %s1445_s8, %s1102_s25 }
  0x92   : > { %v513_v34 = vsub.s32 %v510_v19, %v1422_v24  ;;  %p1100_p12 = pneg %p1099_p6  ;;  %p1105_p4 = scmp.lt.s32.totalorder %s1103_s15, %s1097_s14 }
  0x94   : > { %871 = vmatpush1.bf16.msra.mxu0 %v1001_v15  ;;  %p1106_p11 = por %p1105_p4, %p1104_p13 }
  0x95   : > { %873 = vmatprep.subr.bf16.mxu0 %v1002_v16 }
  0x96   : > { %p1107_p0 = pnand %p1106_p11, %p1100_p12 }
  0x98   : > { %875 = vmatpush1.bf16.msra.mxu0 %v1004_v17  ;;  %v650_v17 = vstv %s1431_s23 }
  0x99   : > { %877 = vmatprep.subr.bf16.mxu0 %v1005_v18 }
  0x9c   : > { %879 = vmatpush1.bf16.msra.mxu0 %v1007_v20 }
  0x9d   : > { %820 = vmatprep.subr.msk.mxu0 %vm370_vm1, %v363_v21 }
  0xa0   : > { %821 = vmatpush1.msk.msra.mxu0 %vm370_vm1, %v362_v22 }
  0xa1   : > { %442 = vmatmul.mubr.f32.vlgmr.msra.gmra.mrb[0].mxu0 %v364_v9  ;;  %v644_v9 = vrot.slane %v635_v51, %v463_v43 }
 0x174   : > { %v443_v63 = vpop.f32.mrb[0].mxu0 }
 0x175   : > { %v467_v5 = vadd.f32 %v460_v46, %v443_v63  ;;  %v542_v6 = vadd.f32 %v535_v49, %v443_v63  ;;  %v615_v7 = vadd.f32 %v608_v50, %v443_v63  ;;  %v445_v8 = vpop.f32.mrb[1].mxu0 }
 0x176   : > { %v468_v10 = vadd.f32 %v464_v53, %v445_v8  ;;  %v543_v11 = vadd.f32 %v539_v57, %v445_v8  ;;  %v616_v13 = vadd.f32 %v612_v58, %v445_v8 }
 0x177   : > { %v483_v14 = vadd.f32 %v476_v48, %v467_v5  ;;  %v558_v15 = vadd.f32 %v551_v52, %v542_v6  ;;  %v631_v16 = vadd.f32 %v624_v59, %v615_v7 }
 0x178   : > { %v484_v18 = vadd.f32 %v480_v54, %v468_v10  ;;  %v559_v20 = vadd.f32 %v555_v61, %v543_v11  ;;  %v632_v21 = vadd.f32 %v628_v4, %v616_v13 }
 0x179   : > { %v499_v22 = vadd.f32 %v492_v55, %v483_v14  ;;  %v574_v25 = vadd.f32 %v567_v56, %v558_v15  ;;  %v647_v26 = vadd.f32 %v640_v0, %v631_v16 }
 0x17a   : > { %v500_v27 = vadd.f32 %v496_v60, %v484_v18  ;;  %v575_v28 = vadd.f32 %v571_v62, %v559_v20  ;;  %v648_v29 = vadd.f32 %v644_v9, %v632_v21 }
 0x17b   : > { %v503_v30 = vadd.f32 %v502_v1, %v499_v22  ;;  %v578_v31 = vadd.f32 %v577_v12, %v574_v25  ;;  %v651_v32 = vadd.f32 %v650_v17, %v647_v26 }
 0x17c   : > { %v504_v33 = vadd.f32 %v502_v1, %v500_v27  ;;  %v579_v35 = vadd.f32 %v577_v12, %v575_v28  ;;  %v652_v36 = vadd.f32 %v650_v17, %v648_v29 }
 0x17e   : > { %v507_v37 = vcombine.low %v503_v30, %v504_v33  ;;  %v582_v38 = vcombine.low %v578_v31, %v579_v35  ;;  %v655_v39 = vcombine.low %v651_v32, %v652_v36 }
 0x180   : > { %v514_v40 = vrot.slane %v507_v37, %v513_v34  ;;  %v589_v41 = vrot.slane %v582_v38, %v513_v34  ;;  %v662_v42 = vrot.slane %v655_v39, %v513_v34 }
 0x182   : > { %v590_v43 = vcombine.high %v589_v41, %v589_v41  ;;  %v521_v44 = vrot.slane %v514_v40, %v513_v34  ;;  %v669_v45 = vrot.slane %v662_v42, %v513_v34 }
 0x184   : > { %527 = vst.msk [vmem:[%s298_s12] ss:$4 sm:$0x3] %vm525_vm2, %v521_v44  ;;  %v597_v24 = vrot.slane %v590_v43, %v513_v34  ;;  %v670_v46 = vcombine.high %v669_v45, %v669_v45 }
 0x186   : > { %831 = vst.msk [vmem:[%s298_s12 + $0x1] ss:$4 sm:$0x3] %vm525_vm2, %v597_v24  ;;  %836 = vst.msk [vmem:[%s298_s12 + $0x2] ss:$4 sm:$0x3] %vm525_vm2, %v670_v46 }
 0x187   : > { %1110 = shalt.err (!%p1107_p0)
}
 0x188   : > { %s1111_s7 = scalar_lea.hbm %s1443_s17, 128  ;;  %s1115_s29 = scalar_lea.hbm %s1492_s5, 256 }
 0x189   : > { %p1112_p3 = scmp.ne.s32.totalorder %s1443_s17, %s1111_s7  ;;  %p1116_p7 = scmp.lt.u32.totalorder %s1443_s17, %s1492_s5 }
 0x18a   : > { %p1117_p2 = scmp.lt.u32.totalorder %s1115_s29, %s1111_s7  ;;  %p1119_p10 = scmp.lt.u32.totalorder %s1111_s7, %s1443_s17 }
 0x18b   : > { %p1113_p1 = pnand %p1112_p3, %p1514_p9 }
 0x18c   : > { %p1118_p8 = por %p1117_p2, %p1116_p7 }
 0x18d   : > { %p1114_p5 = pneg %p1113_p1 }
 0x18e   : > { %p1120_p6 = por %p1119_p10, %p1118_p8 }
 0x190   : > { %p1121_p12 = pnand %p1120_p6, %p1114_p5 }
 0x192   : > { %1124 = shalt.err (!%p1121_p12)
}
 0x193   : > { %914 = dma.vmem_to_hbm [thread:$0]  (%p1514_p9), %s1445_s8, 128, %s1443_s17, %s675_s22  }
 0x194 PF: > { %s701_s10 = sand.u32 1, %s1163_s18   ;;  %p1515_p13 = scmp.ne.s32.totalorder %s1501_s6, 0 }
 0x195   : > { %p1516_p4 = scmp.ge.s32.totalorder %s1175_s21, 2  ;;  %s702_s12 = scalar_lea.sflag [#allocation4], %s701_s10 }
 0x197   : > { %p931_p11 = pnand %p1516_p4, %p1515_p13 }
 0x199   : > { %1158 = dma.done.wait (!%p931_p11), %s702_s12, 128  }
 0x19a   : > { %1160 = vsyncadd (!%p931_p11), %s702_s12, 4294967168  ;;  %p21_p0 = scmp.ge.s32.totalorder %s1241_s24, 4   ;;  %s1517_s18 = smov %s1167_s19 }
 0x19b   : > { %s1518_s19 = smov %s1171_s20  ;;  %s1519_s20 = smov %s1253_s27 }
 0x19c   : > { %s1520_s21 = smov %s1241_s24  ;;  %23 = sbr.rel (!%p21_p0) target bundleno = 8 (0x8), region = 106 }
 0x1a3   :  { %707 = vsyncpa [#allocation3], 1 }
 0x1a4   :  { %709 = vsyncpa [#allocation3 + $0x1], 1 }
 0x1a5   :  { %710 = vsyncpa [#allocation10], 1 }
 0x1a6   :  { %712 = vsyncpa [#allocation10 + $0x1], 1 }
 0x1a7   :  { %713 = vsyncpa [#allocation4], 1 }
 0x1a8   :  { %715 = vsyncpa [#allocation4 + $0x1], 1 }
 0x1a9   :  { %716 = vsyncpa [#allocation5], 1 }
 0x1aa   :  { %718 = vsyncpa [#allocation5 + $0x1], 1 }
 0x1ab   :  { %719 = vsyncpa [#allocation7], 1 }

</bundles_post_ra>
